<compile_context>
chip_gen: v6e
topology: v6e:2x2x1
jax: 0.10.0
libtpu: 0.0.40
codegen_flags: <defaults>
</compile_context>

<pallas_src>
import numpy as np
import jax
import jax.numpy as jnp
from jax.experimental import pallas as pl
from jax.experimental.pallas import tpu as pltpu


# Row layout of the packed small-parameter operand ([8, H] float32).
_ROW_BG, _ROW_GAMMA, _ROW_BETA, _ROW_B2, _ROW_W3, _ROW_B3 = 0, 1, 2, 3, 4, 5


def _gcn_pool_kernel(x_ref, a_ref, wg_ref, packed_ref, pool_ref):
    """Per step: GCNConv + ReLU + LayerNorm for g chain graphs; accumulate global pool.

    x_ref     : [g*N, Fp]  node features (graph-major rows), matmul dtype
    a_ref     : [g, N, N]  normalized chain adjacency, broadcast over the g graphs
    wg_ref    : [Fp, H]    GCN weight (feature dim zero-padded to Fp; padding inert)
    packed_ref: [8, H]     packed small params (bg / gamma / beta / ...), f32
    pool_ref  : [8, H]     pooled partial rows for this core split (accumulator)
    """
    t = pl.program_id(1)

    @pl.when(t == 0)
    def _init():
        pool_ref[...] = jnp.zeros_like(pool_ref)

    g, n, _ = a_ref.shape
    fp = x_ref.shape[1]
    h_dim = wg_ref.shape[1]

    # --- GCNConv: aggregate first (F < H => fewer MACs), then project. ---
    x3 = x_ref[...].reshape(g, n, fp)                                    # [g, N, Fp]
    ax3 = jnp.einsum('gnm,gmf->gnf', a_ref[...], x3,
                     preferred_element_type=jnp.float32)                 # [g, N, Fp] f32
    ax = ax3.reshape(g * n, fp).astype(x_ref.dtype)                      # [R, Fp]
    h = jnp.dot(ax, wg_ref[...], preferred_element_type=jnp.float32)     # [R, H] f32
    h = jnp.maximum(h + packed_ref[_ROW_BG:_ROW_BG + 1, :], 0.0)         # + bias, ReLU

    # --- LayerNorm over the TRUE hidden width H (two-pass moments, torch eps). ---
    inv_h = 1.0 / h_dim
    mean = jnp.sum(h, axis=-1, keepdims=True) * inv_h
    d = h - mean
    var = jnp.sum(d * d, axis=-1, keepdims=True) * inv_h
    ln = d * jax.lax.rsqrt(var + 1e-5)
    ln = (ln * packed_ref[_ROW_GAMMA:_ROW_GAMMA + 1, :]
          + packed_ref[_ROW_BETA:_ROW_BETA + 1, :])

    # --- global_add_pool (batch vector all zeros): running sum over every node of every
    #     graph.  Keep 8 partial sublane rows; the head kernel collapses them. ---
    rows = g * n
    pool_ref[...] += jnp.sum(ln.reshape(rows // 8, 8, h_dim), axis=0)    # [8, H]


def _head_kernel(pool_ref, w2_ref, packed_ref, out_ref):
    """Collapse pooled partials of all core splits and run the MLP head (l2, l3)."""
    pooled = jnp.sum(pool_ref[...], axis=0, keepdims=True)               # [1, H]
    y = jnp.dot(pooled, w2_ref[...], preferred_element_type=jnp.float32)
    y = jnp.maximum(y + packed_ref[_ROW_B2:_ROW_B2 + 1, :], 0.0)         # [1, H]
    # l3 on the VPU: lane multiply + lane reduce; b3 is lane-broadcast so the whole
    # [1, H] output slab holds the scalar (wrapper slices [:, :1]).
    out = (jnp.sum(y * packed_ref[_ROW_W3:_ROW_W3 + 1, :], axis=-1, keepdims=True)
           + packed_ref[_ROW_B3:_ROW_B3 + 1, :])                         # [1, H]
    out_ref[...] = out


def build_chain_gcn_norm(n):
    """Normalized adjacency D^-1/2 (A + I) D^-1/2 for an undirected chain of n nodes."""
    a_hat = np.eye(n, dtype=np.float32)
    for i in range(n - 1):
        a_hat[i, i + 1] = 1.0
        a_hat[i + 1, i] = 1.0
    deg = a_hat.sum(axis=1)
    d_inv_sqrt = 1.0 / np.sqrt(deg)
    return a_hat * d_inv_sqrt[:, None] * d_inv_sqrt[None, :]


def critic_forward(sa, params, *, graphs_per_step=None, core_splits=1,
                   matmul_dtype=jnp.float32):
    """Forward pass of Critic (is_linear=False, squeeze=True, bs == batch).

    sa:              [B, N, F] float32 node features (state || action).
    params:          dict from init_params.
    graphs_per_step: graphs per grid step (None -> largest divisor with <= 512 node rows).
    core_splits:     leading "parallel" grid axis; set 2 on v7x (2 TensorCores / chip),
                     harmless (serialized) on v5e / v6e.
    matmul_dtype:    dtype of the streaming MXU operands (x / adjacency / Wg);
                     jnp.bfloat16 halves the X HBM stream, accumulation stays f32.
    """
    B, N, F = sa.shape
    H = params["w2"].shape[0]

    if B % core_splits != 0:
        raise ValueError("core_splits must divide the number of graphs")
    per_core = B // core_splits
    if graphs_per_step is None:
        cap = max(1, 512 // N)
        graphs_per_step = max(d for d in range(1, per_core + 1)
                              if per_core % d == 0 and d <= cap)
    if per_core % graphs_per_step != 0:
        raise ValueError("graphs_per_step must divide the per-core graph count")
    R = graphs_per_step * N
    if R % 8 != 0:
        raise ValueError("graphs_per_step * N must be a multiple of 8 (sublane tile)")
    # TODO(synk): N not a multiple of 8 (with zero-padded node rows) would need a row mask
    # before pooling, because ReLU(0 + bg) != 0 would leak into the global pool.
    steps_per_split = per_core // graphs_per_step

    # Node-feature rows, feature dim zero-padded to the sublane grain (inert padding).
    fp = max(8, ((F + 7) // 8) * 8)
    x_flat = jnp.pad(sa.reshape(B * N, F).astype(jnp.float32),
                     ((0, 0), (0, fp - F))).astype(matmul_dtype)
    wg_p = jnp.pad(params["wg"].astype(jnp.float32),
                   ((0, fp - F), (0, 0))).astype(matmul_dtype)

    # Shared normalized chain adjacency, broadcast over the g graphs of one step.
    # (numpy constant -> folded at jit-trace time, no per-call host work / H2D.)
    a_b = jnp.broadcast_to(
        jnp.asarray(build_chain_gcn_norm(N), dtype=matmul_dtype),
        (graphs_per_step, N, N))

    # Pack the six tiny per-feature parameters into ONE [8, H] f32 operand.
    packed = jnp.concatenate(
        [params["bg"].reshape(1, H).astype(jnp.float32),
         params["gamma"].reshape(1, H).astype(jnp.float32),
         params["beta"].reshape(1, H).astype(jnp.float32),
         params["b2"].reshape(1, H).astype(jnp.float32),
         params["w3"].reshape(1, H).astype(jnp.float32),          # w3 column as a row
         jnp.broadcast_to(params["b3"].reshape(1, 1).astype(jnp.float32), (1, H)),
         jnp.zeros((2, H), jnp.float32)],
        axis=0)

    # ---- Kernel 1: GCN + LayerNorm + global-add-pool partials per core split. ----
    partials = pl.pallas_call(
        _gcn_pool_kernel,
        out_shape=jax.ShapeDtypeStruct((core_splits * 8, H), jnp.float32),
        grid_spec=pltpu.PrefetchScalarGridSpec(
            num_scalar_prefetch=0,
            grid=(core_splits, steps_per_split),
            in_specs=[
                pl.BlockSpec((R, fp), lambda s, t: (s * steps_per_split + t, 0)),
                pl.BlockSpec((graphs_per_step, N, N), lambda s, t: (0, 0, 0)),
                pl.BlockSpec((fp, H), lambda s, t: (0, 0)),
                pl.BlockSpec((8, H), lambda s, t: (0, 0)),
            ],
            out_specs=pl.BlockSpec((8, H), lambda s, t: (s, 0)),
        ),
        compiler_params=pltpu.CompilerParams(
            # Split axis shards across TensorCores (v7x megacore); step axis is the
            # running reduction into the pooled accumulator held in the output block.
            dimension_semantics=("parallel", "arbitrary")),
    )(x_flat, a_b, wg_p, packed)

    # ---- Kernel 2: collapse partials + MLP head (l2, l3). ----
    out = pl.pallas_call(
        _head_kernel,
        out_shape=jax.ShapeDtypeStruct((1, H), jnp.float32),
        grid_spec=pltpu.PrefetchScalarGridSpec(
            num_scalar_prefetch=0,
            grid=(1,),
            in_specs=[
                pl.BlockSpec((core_splits * 8, H), lambda i: (0, 0)),
                pl.BlockSpec((H, H), lambda i: (0, 0)),
                pl.BlockSpec((8, H), lambda i: (0, 0)),
            ],
            out_specs=pl.BlockSpec((1, H), lambda i: (0, 0)),
        ),
        compiler_params=pltpu.CompilerParams(dimension_semantics=("arbitrary",)),
    )(partials, params["w2"].astype(jnp.float32), packed)

    # Output slab is lane-broadcast with the scalar; slice back to the module's [1, 1].
    return out[:, :1]


def init_params(key, state_dim, hidden_dim):
    """Deterministic synthetic parameters (shapes from Critic.__init__); [in, out] layout."""
    ks = jax.random.split(key, 6)
    s = 0.1
    return {
        # GCNConv(state_dim, hidden_dim)
        "wg": jax.random.uniform(ks[0], (state_dim, hidden_dim), jnp.float32, -s, s),
        "bg": jax.random.uniform(ks[1], (1, hidden_dim), jnp.float32, -s, s),
        # LayerNorm(hidden_dim)
        "gamma": jnp.ones((1, hidden_dim), jnp.float32),
        "beta": jnp.zeros((1, hidden_dim), jnp.float32),
        # l2: Linear(hidden_dim, hidden_dim)
        "w2": jax.random.uniform(ks[2], (hidden_dim, hidden_dim), jnp.float32, -s, s),
        "b2": jax.random.uniform(ks[3], (1, hidden_dim), jnp.float32, -s, s),
        # l3: Linear(hidden_dim, 1)
        "w3": jax.random.uniform(ks[4], (hidden_dim, 1), jnp.float32, -s, s),
        "b3": jax.random.uniform(ks[5], (1, 1), jnp.float32, -s, s),
        # TODO(synk): l1 (Linear(state_dim_2, hidden_dim)) only feeds the is_linear=True
        # branch and squeeze=False only changes the pooling target; neither is on the
        # default forward path, so they are not materialized here.
    }


def reference_forward(sa, a_norm, p, conv_dtype=jnp.float32):
    """Pure-JAX reference.  conv_dtype mirrors the kernel's MXU-operand rounding points
    so the bf16 configuration can be checked tightly; f32 is the plain module math."""
    a_c = a_norm.astype(conv_dtype)
    x_c = sa.astype(conv_dtype)
    ax = jnp.einsum('nm,bmf->bnf', a_c, x_c, preferred_element_type=jnp.float32)
    h = jnp.einsum('bnf,fh->bnh', ax.astype(conv_dtype), p["wg"].astype(conv_dtype),
                   preferred_element_type=jnp.float32)
    h = jnp.maximum(h + p["bg"], 0.0)
    mean = h.mean(-1, keepdims=True)
    var = ((h - mean) ** 2).mean(-1, keepdims=True)
    ln = (h - mean) / jnp.sqrt(var + 1e-5) * p["gamma"] + p["beta"]
    pooled = ln.sum(axis=(0, 1))[None, :]
    y = jnp.maximum(pooled @ p["w2"] + p["b2"], 0.0)
    return y @ p["w3"] + p["b3"]


if __name__ == "__main__":
    B = 64           # batch of graphs (single DataLoader batch, bs == B)
    N = 8            # chain length (number of inventory nodes)
    STATE_F = 4      # per-node state features
    ACTION_F = 1     # per-node action features
    HIDDEN = 32
    STATE_DIM = STATE_F + ACTION_F   # = 5 node features, matches create_torch_graph_data

    key = jax.random.PRNGKey(0)
    k_state, k_action, k_param = jax.random.split(key, 3)

    state = jax.random.normal(k_state, (B, N, STATE_F), jnp.float32)
    action = jax.random.normal(k_action, (B, N, ACTION_F), jnp.float32)
    sa = jnp.concatenate([state, action], axis=-1)   # [B, N, 5]

    params = init_params(k_param, STATE_DIM, HIDDEN)
    a_norm = jnp.asarray(build_chain_gcn_norm(N))

    fwd = jax.jit(critic_forward,
                  static_argnames=("graphs_per_step", "core_splits", "matmul_dtype"))

    # Config 1: f32 MXU operands, single core split -> grid (1, 4), R = 128 rows/step.
    out_f32 = jax.block_until_ready(
        fwd(sa, params, graphs_per_step=16, core_splits=1, matmul_dtype=jnp.float32))
    ref_f32 = reference_forward(sa, a_norm, params)
    assert out_f32.shape == (1, 1)
    assert jnp.allclose(out_f32, ref_f32, atol=5e-4, rtol=5e-4), (out_f32, ref_f32)

    # Config 2: bf16 MXU operands + 2 core splits (v7x megacore path; serialized on 1-TC
    # chips) -> grid (2, 2).  Checked against a reference with matching bf16 rounding.
    out_bf16 = jax.block_until_ready(
        fwd(sa, params, graphs_per_step=16, core_splits=2, matmul_dtype=jnp.bfloat16))
    ref_bf16 = reference_forward(sa, a_norm, params, conv_dtype=jnp.bfloat16)
    assert out_bf16.shape == (1, 1)
    assert jnp.allclose(out_bf16, ref_bf16, atol=2e-2, rtol=2e-2), (out_bf16, ref_bf16)

    print("KERNEL_OK")
</pallas_src>

<mosaic_0001>
module attributes {stable_mosaic.version = 11 : i64} {
  func.func @_gcn_pool_kernel(%arg0: i32, %arg1: i32, %arg2: memref<128x8xf32, #tpu.memory_space<vmem>>, %arg3: memref<16x8x8xf32, #tpu.memory_space<vmem>>, %arg4: memref<8x32xf32, #tpu.memory_space<vmem>>, %arg5: memref<8x32xf32, #tpu.memory_space<vmem>>, %arg6: memref<8x32xf32, #tpu.memory_space<vmem>>) attributes {dimension_semantics = [#tpu.dimension_semantics<parallel>, #tpu.dimension_semantics<arbitrary>], iteration_bounds = array<i64: 1, 4>, scalar_prefetch = 0 : i64, scratch_operands = 0 : i64, tpu.core_type = #tpu.core_type<tc>, window_params = [{transform_indices = @transform_0, window_bounds = array<i64: 128, 8>}, {pipeline_mode = #tpu.pipeline_mode<synchronous>, transform_indices = @transform_1, window_bounds = array<i64: 16, 8, 8>}, {pipeline_mode = #tpu.pipeline_mode<synchronous>, transform_indices = @transform_2, window_bounds = array<i64: 8, 32>}, {pipeline_mode = #tpu.pipeline_mode<synchronous>, transform_indices = @transform_3, window_bounds = array<i64: 8, 32>}, {transform_indices = @transform_4, window_bounds = array<i64: 8, 32>}]} {
    %c0_i32 = arith.constant 0 : i32
    %0 = arith.cmpi eq, %arg1, %c0_i32 : i32
    %1 = arith.extui %0 : i1 to i32
    %c0_i32_0 = arith.constant 0 : i32
    %2 = arith.cmpi ne, %1, %c0_i32_0 : i32
    scf.if %2 {
      %cst_23 = arith.constant 0.000000e+00 : f32
      %42 = vector.broadcast %cst_23 : f32 to vector<8x32xf32>
      %c0_24 = arith.constant 0 : index
      %c0_25 = arith.constant 0 : index
      %43 = vector.load %arg6[%c0_24, %c0_25] : memref<8x32xf32, #tpu.memory_space<vmem>>, vector<8x32xf32>
      tpu.vector_store %arg6[%c0_24, %c0_25], %42 {strides = array<i32>} : memref<8x32xf32, #tpu.memory_space<vmem>>, vector<8x32xf32>,
    } else {
    }
    %c0 = arith.constant 0 : index
    %c0_1 = arith.constant 0 : index
    %3 = vector.load %arg2[%c0, %c0_1] : memref<128x8xf32, #tpu.memory_space<vmem>>, vector<128x8xf32>
    %4 = vector.shape_cast %3 : vector<128x8xf32> to vector<16x8x8xf32>
    %c0_2 = arith.constant 0 : index
    %c0_3 = arith.constant 0 : index
    %c0_4 = arith.constant 0 : index
    %5 = vector.load %arg3[%c0_2, %c0_3, %c0_4] : memref<16x8x8xf32, #tpu.memory_space<vmem>>, vector<16x8x8xf32>
    "tpu.trace_start"() <{level = 10 : i32, message = "gnm,gmf->gnf"}> : () -> ()
    %cst = arith.constant dense<0.000000e+00> : vector<16x8x8xf32>
    %6 = tpu.matmul %5, %4, %cst {dimension_numbers = #tpu.dot_dimension_numbers<[2], [1], [1], [2], [0, 0, 0, 1, 1, 2], [0], [0]>} : vector<16x8x8xf32>, vector<16x8x8xf32>, vector<16x8x8xf32> -> vector<16x8x8xf32>
    "tpu.trace_stop"() : () -> ()
    %7 = vector.shape_cast %6 : vector<16x8x8xf32> to vector<128x8xf32>
    %c0_5 = arith.constant 0 : index
    %c0_6 = arith.constant 0 : index
    %8 = vector.load %arg4[%c0_5, %c0_6] : memref<8x32xf32, #tpu.memory_space<vmem>>, vector<8x32xf32>
    %cst_7 = arith.constant dense<0.000000e+00> : vector<128x32xf32>
    %9 = tpu.matmul %7, %8, %cst_7 {dimension_numbers = #tpu.dot_dimension_numbers<[1], [0], [0], [1], [0, 0, 1, 1], [], []>} : vector<128x8xf32>, vector<8x32xf32>, vector<128x32xf32> -> vector<128x32xf32>
    %c0_8 = arith.constant 0 : index
    %c0_9 = arith.constant 0 : index
    %10 = vector.load %arg5[%c0_8, %c0_9] : memref<8x32xf32, #tpu.memory_space<vmem>>, vector<1x32xf32>
    %11 = vector.broadcast %10 : vector<1x32xf32> to vector<128x32xf32>
    %12 = arith.addf %9, %11 : vector<128x32xf32>
    %cst_10 = arith.constant 0.000000e+00 : f32
    %13 = vector.broadcast %cst_10 : f32 to vector<128x32xf32>
    %14 = arith.maximumf %12, %13 : vector<128x32xf32>
    %cst_11 = arith.constant dense<0.000000e+00> : vector<128xf32>
    %15 = vector.multi_reduction <add>, %14, %cst_11 [1] : vector<128x32xf32> to vector<128xf32>
    %16 = vector.shape_cast %15 : vector<128xf32> to vector<128x1xf32>
    %cst_12 = arith.constant 3.125000e-02 : f32
    %17 = vector.broadcast %cst_12 : f32 to vector<128x1xf32>
    %18 = arith.mulf %16, %17 : vector<128x1xf32>
    %19 = vector.broadcast %18 : vector<128x1xf32> to vector<128x32xf32>
    %20 = arith.subf %14, %19 : vector<128x32xf32>
    %21 = arith.mulf %20, %20 : vector<128x32xf32>
    %cst_13 = arith.constant dense<0.000000e+00> : vector<128xf32>
    %22 = vector.multi_reduction <add>, %21, %cst_13 [1] : vector<128x32xf32> to vector<128xf32>
    %23 = vector.shape_cast %22 : vector<128xf32> to vector<128x1xf32>
    %cst_14 = arith.constant 3.125000e-02 : f32
    %24 = vector.broadcast %cst_14 : f32 to vector<128x1xf32>
    %25 = arith.mulf %23, %24 : vector<128x1xf32>
    %cst_15 = arith.constant 9.99999974E-6 : f32
    %26 = vector.broadcast %cst_15 : f32 to vector<128x1xf32>
    %27 = arith.addf %25, %26 : vector<128x1xf32>
    %28 = math.rsqrt %27 : vector<128x1xf32>
    %29 = vector.broadcast %28 : vector<128x1xf32> to vector<128x32xf32>
    %30 = arith.mulf %20, %29 : vector<128x32xf32>
    %c1 = arith.constant 1 : index
    %c0_16 = arith.constant 0 : index
    %31 = vector.load %arg5[%c1, %c0_16] : memref<8x32xf32, #tpu.memory_space<vmem>>, vector<1x32xf32>
    %32 = vector.broadcast %31 : vector<1x32xf32> to vector<128x32xf32>
    %33 = arith.mulf %30, %32 : vector<128x32xf32>
    %c2 = arith.constant 2 : index
    %c0_17 = arith.constant 0 : index
    %34 = vector.load %arg5[%c2, %c0_17] : memref<8x32xf32, #tpu.memory_space<vmem>>, vector<1x32xf32>
    %35 = vector.broadcast %34 : vector<1x32xf32> to vector<128x32xf32>
    %36 = arith.addf %33, %35 : vector<128x32xf32>
    %c0_18 = arith.constant 0 : index
    %c0_19 = arith.constant 0 : index
    %37 = vector.load %arg6[%c0_18, %c0_19] : memref<8x32xf32, #tpu.memory_space<vmem>>, vector<8x32xf32>
    %38 = vector.shape_cast %36 : vector<128x32xf32> to vector<16x8x32xf32>
    %cst_20 = arith.constant dense<0.000000e+00> : vector<8x32xf32>
    %39 = vector.multi_reduction <add>, %38, %cst_20 [0] : vector<16x8x32xf32> to vector<8x32xf32>
    %40 = arith.addf %37, %39 : vector<8x32xf32>
    %c0_21 = arith.constant 0 : index
    %c0_22 = arith.constant 0 : index
    %41 = vector.load %arg6[%c0_21, %c0_22] : memref<8x32xf32, #tpu.memory_space<vmem>>, vector<8x32xf32>
    tpu.vector_store %arg6[%c0_21, %c0_22], %40 {strides = array<i32>} : memref<8x32xf32, #tpu.memory_space<vmem>>, vector<8x32xf32>,
    return
  }
  func.func @transform_0(%arg0: i32, %arg1: i32) -> (i32, i32) {
    %c4_i32 = arith.constant 4 : i32
    %0 = arith.muli %arg0, %c4_i32 : i32
    %1 = arith.addi %0, %arg1 : i32
    %c0_i32 = arith.constant 0 : i32
    %c0_i32_0 = arith.constant 0 : i32
    return %1, %c0_i32 : i32, i32
  }
  func.func @transform_1(%arg0: i32, %arg1: i32) -> (i32, i32, i32) {
    %c0_i32 = arith.constant 0 : i32
    %c0_i32_0 = arith.constant 0 : i32
    %c0_i32_1 = arith.constant 0 : i32
    %c0_i32_2 = arith.constant 0 : i32
    return %c0_i32, %c0_i32_0, %c0_i32_1 : i32, i32, i32
  }
  func.func @transform_2(%arg0: i32, %arg1: i32) -> (i32, i32) {
    %c0_i32 = arith.constant 0 : i32
    %c0_i32_0 = arith.constant 0 : i32
    %c0_i32_1 = arith.constant 0 : i32
    return %c0_i32, %c0_i32_0 : i32, i32
  }
  func.func @transform_3(%arg0: i32, %arg1: i32) -> (i32, i32) {
    %c0_i32 = arith.constant 0 : i32
    %c0_i32_0 = arith.constant 0 : i32
    %c0_i32_1 = arith.constant 0 : i32
    return %c0_i32, %c0_i32_0 : i32, i32
  }
  func.func @transform_4(%arg0: i32, %arg1: i32) -> (i32, i32) {
    %c0_i32 = arith.constant 0 : i32
    %c0_i32_0 = arith.constant 0 : i32
    return %arg0, %c0_i32 : i32, i32
  }
}

module attributes {stable_mosaic.version = 11 : i64} {
  func.func @_head_kernel(%arg0: i32, %arg1: memref<8x32xf32, #tpu.memory_space<vmem>>, %arg2: memref<32x32xf32, #tpu.memory_space<vmem>>, %arg3: memref<8x32xf32, #tpu.memory_space<vmem>>, %arg4: memref<1x32xf32, #tpu.memory_space<vmem>>) attributes {dimension_semantics = [#tpu.dimension_semantics<arbitrary>], iteration_bounds = array<i64: 1>, scalar_prefetch = 0 : i64, scratch_operands = 0 : i64, tpu.core_type = #tpu.core_type<tc>, window_params = [{pipeline_mode = #tpu.pipeline_mode<synchronous>, transform_indices = @transform_0, window_bounds = array<i64: 8, 32>}, {pipeline_mode = #tpu.pipeline_mode<synchronous>, transform_indices = @transform_1, window_bounds = array<i64: 32, 32>}, {pipeline_mode = #tpu.pipeline_mode<synchronous>, transform_indices = @transform_2, window_bounds = array<i64: 8, 32>}, {pipeline_mode = #tpu.pipeline_mode<synchronous>, transform_indices = @transform_3, window_bounds = array<i64: 1, 32>}]} {
    %c0 = arith.constant 0 : index
    %c0_0 = arith.constant 0 : index
    %0 = vector.load %arg1[%c0, %c0_0] : memref<8x32xf32, #tpu.memory_space<vmem>>, vector<8x32xf32>
    %cst = arith.constant dense<0.000000e+00> : vector<32xf32>
    %1 = vector.multi_reduction <add>, %0, %cst [0] : vector<8x32xf32> to vector<32xf32>
    %2 = vector.shape_cast %1 : vector<32xf32> to vector<1x32xf32>
    %c0_1 = arith.constant 0 : index
    %c0_2 = arith.constant 0 : index
    %3 = vector.load %arg2[%c0_1, %c0_2] : memref<32x32xf32, #tpu.memory_space<vmem>>, vector<32x32xf32>
    %cst_3 = arith.constant dense<0.000000e+00> : vector<1x32xf32>
    %4 = tpu.matmul %2, %3, %cst_3 {dimension_numbers = #tpu.dot_dimension_numbers<[1], [0], [0], [1], [0, 0, 1, 1], [], []>} : vector<1x32xf32>, vector<32x32xf32>, vector<1x32xf32> -> vector<1x32xf32>
    %c3 = arith.constant 3 : index
    %c0_4 = arith.constant 0 : index
    %5 = vector.load %arg3[%c3, %c0_4] : memref<8x32xf32, #tpu.memory_space<vmem>>, vector<1x32xf32>
    %6 = arith.addf %4, %5 : vector<1x32xf32>
    %cst_5 = arith.constant 0.000000e+00 : f32
    %7 = vector.broadcast %cst_5 : f32 to vector<1x32xf32>
    %8 = arith.maximumf %6, %7 : vector<1x32xf32>
    %c4 = arith.constant 4 : index
    %c0_6 = arith.constant 0 : index
    %9 = vector.load %arg3[%c4, %c0_6] : memref<8x32xf32, #tpu.memory_space<vmem>>, vector<1x32xf32>
    %10 = arith.mulf %8, %9 : vector<1x32xf32>
    %cst_7 = arith.constant dense<0.000000e+00> : vector<1xf32>
    %11 = vector.multi_reduction <add>, %10, %cst_7 [1] : vector<1x32xf32> to vector<1xf32>
    %12 = vector.shape_cast %11 : vector<1xf32> to vector<1x1xf32>
    %c5 = arith.constant 5 : index
    %c0_8 = arith.constant 0 : index
    %13 = vector.load %arg3[%c5, %c0_8] : memref<8x32xf32, #tpu.memory_space<vmem>>, vector<1x32xf32>
    %14 = vector.broadcast %12 : vector<1x1xf32> to vector<1x32xf32>
    %15 = arith.addf %14, %13 : vector<1x32xf32>
    %c0_9 = arith.constant 0 : index
    %c0_10 = arith.constant 0 : index
    %16 = vector.load %arg4[%c0_9, %c0_10] : memref<1x32xf32, #tpu.memory_space<vmem>>, vector<1x32xf32>
    tpu.vector_store %arg4[%c0_9, %c0_10], %15 {strides = array<i32>} : memref<1x32xf32, #tpu.memory_space<vmem>>, vector<1x32xf32>,
    return
  }
  func.func @transform_0(%arg0: i32) -> (i32, i32) {
    %c0_i32 = arith.constant 0 : i32
    %c0_i32_0 = arith.constant 0 : i32
    %c0_i32_1 = arith.constant 0 : i32
    return %c0_i32, %c0_i32_0 : i32, i32
  }
  func.func @transform_1(%arg0: i32) -> (i32, i32) {
    %c0_i32 = arith.constant 0 : i32
    %c0_i32_0 = arith.constant 0 : i32
    %c0_i32_1 = arith.constant 0 : i32
    return %c0_i32, %c0_i32_0 : i32, i32
  }
  func.func @transform_2(%arg0: i32) -> (i32, i32) {
    %c0_i32 = arith.constant 0 : i32
    %c0_i32_0 = arith.constant 0 : i32
    %c0_i32_1 = arith.constant 0 : i32
    return %c0_i32, %c0_i32_0 : i32, i32
  }
  func.func @transform_3(%arg0: i32) -> (i32, i32) {
    %c0_i32 = arith.constant 0 : i32
    %c0_i32_0 = arith.constant 0 : i32
    %c0_i32_1 = arith.constant 0 : i32
    return %c0_i32, %c0_i32_0 : i32, i32
  }
}

</mosaic_0001>

<bundles_post_ra>
// kernel: critic_forward.3
= control target key start
LH: loop header
LB: loop body
LE: loop exit
PB: predicated region body
PF: predicated region fallthrough
CT: control target
= control target key end

     0   :  { %vm16_vm0 = vcmask 261120   ;;  %v168_v1 = vmov 0.0   ;;  %vm169_vm1 = vmmov 0   ;;  %s220_s0 = inlined_call_operand.vmem [shape: f32[8,32], index: 0, kind: input, shape index: {}]   ;;  %s221_s1 = inlined_call_operand.vmem [shape: f32[32,32], index: 1, kind: input, shape index: {}]   ;;  %s222_s2 = inlined_call_operand.vmem [shape: f32[8,32], index: 2, kind: input, shape index: {}]   ;;  %s223_s3 = inlined_call_operand.hbm [shape: f32[1,32], index: 3, kind: output, shape index: {}]  }
   0x1   :  { %v27_v0 = vld [vmem:[%s221_s1 + $0x18] sm:$0xff]  ;;  %132 = vmatprep.subr.mxu0 %v168_v1  ;;  %v26_v2 = vld [vmem:[%s221_s1 + $0x10] sm:$0xff]  ;;  %140 = vmatprep.mubr.msk.f32.mxu0 %vm169_vm1, %v168_v1  ;;  %v15_v3 = vld [vmem:[%s220_s0] sm:$0xff] }
   0x2   :  { %133 = vmatpush3.msra.mxu0 %v27_v0  ;;  %v17_v4 = vsel %vm16_vm0, %v15_v3, 0.0 }
   0x3   :  { %8 = vsyncpa [#allocation3], 0  ;;  %134 = vmatprep.subr.mxu0 %v168_v1  ;;  %v25_v5 = vld [vmem:[%s221_s1 + $0x8] sm:$0xff]  ;;  %v18_v6 = vrot.slane %v17_v4, 4  ;;  %v24_v7 = vld [vmem:[%s221_s1] sm:$0xff]  ;;  %vm105_vm2 = vcmask 253952  }
   0x4   :  { %135 = vmatpush3.msra.mxu0 %v26_v2  ;;  %v28_v13 = vld [vmem:[%s222_s2 + $0x3] sm:$0x1]  ;;  %v103_v17 = vld [vmem:[%s222_s2 + $0x4] sm:$0x1]  ;;  %v109_v21 = vld [vmem:[%s222_s2 + $0x5] sm:$0x1] }
   0x5   :  { %136 = vmatprep.subr.mxu0 %v168_v1  ;;  %v19_v8 = vadd.f32 %v18_v6, %v17_v4  ;;  %s170_s26 = smov [#allocation2]  }
   0x6   :  { %137 = vmatpush3.msra.mxu0 %v25_v5  ;;  %s118_s27 = sshll.u32 %s170_s26, 4  ;;  %s119_s27 = int_to_ptr.vmem [resolvable:$true] %s118_s27 }
   0x7   :  { %138 = vmatprep.subr.mxu0 %v168_v1  ;;  %v20_v9 = vrot.slane %v19_v8, 2  ;;  %s146_s28 = scalar_lea.vmem %s119_s27, 16  ;;  %s150_s29 = scalar_lea.vmem %s119_s27, 32 }
   0x8   :  { %139 = vmatpush3.msra.mxu0 %v24_v7  ;;  %p147_p0 = scmp.ne.s32.totalorder %s119_s27, %s146_s28  ;;  %p151_p1 = scmp.lt.s32.totalorder %s119_s27, %s119_s27 }
   0x9   :  { %v21_v10 = vadd.f32 %v20_v9, %v19_v8  ;;  %p152_p2 = scmp.lt.s32.totalorder %s150_s29, %s146_s28 }
   0xb   :  { %v22_v11 = vrot.slane %v21_v10, 1  ;;  %p153_p3 = por %p152_p2, %p151_p1 }
   0xd   :  { %v23_v12 = vadd.f32 %v22_v11, %v21_v10  ;;  %p154_p4 = pnand %p153_p3, %p147_p0 }
   0xf   :  { %141 = vmatmul.mubr.msk.f32.vlgmr.msra.gmra.mxu0 %vm16_vm0, %v23_v12 }
  0xcf   :  { %v98_v14 = vpop.f32.mrf.mxu0 }
  0xd0   :  { %v99_v15 = vadd.f32 %v98_v14, %v28_v13 }
  0xd1   :  { %v142_v16 = vpop.f32.mrf.mxu0 }
  0xd2   :  { %v102_v18 = vmax.f32 %v99_v15, 0.0 }
  0xd4   :  { %v104_v19 = vmul.f32 %v103_v17, %v102_v18 }
  0xd6   :  { %v106_v20 = vsel %vm105_vm2, %v104_v19, 0.0 }
  0xd7   :  { %107 = vadd.xlane.f32.xlu0 %v106_v20 }
 0x160   :  { %v108_v22 = vpop.xlane.xlu0 %107 }
 0x161   :  { %v110_v23 = vadd.f32 %v109_v21, %v108_v22 }
 0x163   :  { %111 = vst.msk [vmem:[#allocation2] sm:$0x1] %vm105_vm2, %v110_v23 }
 0x164   :  { %157 = shalt.err (!%p154_p4)
}
 0x165   :  { %121 = dma.vmem_to_hbm [thread:$0]  %s119_s27, 16, %s223_s3, [#allocation3]  }
 0x166   :  { %166 = dma.done.wait [#allocation3], 16  }
 0x167   :  { %167 = vsyncadd [#allocation3], 4294967280 }
 0x168   :  { %125 = vsyncpa [#allocation3], 1 }

// kernel: critic_forward.2
= control target key start
LH: loop header
LB: loop body
LE: loop exit
PB: predicated region body
PF: predicated region fallthrough
CT: control target
= control target key end

     0   :  { %s2303_s15 = smov 0   ;;  %s2305_s16 = smov 0   ;;  %s2795_s0 = inlined_call_operand.vmem [shape: f32[512,8], index: 0, kind: input, shape index: {}]   ;;  %s2796_s1 = inlined_call_operand.vmem [shape: f32[16,8,8], index: 1, kind: input, shape index: {}]   ;;  %s2797_s2 = inlined_call_operand.vmem [shape: f32[8,32], index: 2, kind: input, shape index: {}]   ;;  %s2798_s3 = inlined_call_operand.vmem [shape: f32[8,32], index: 3, kind: input, shape index: {}]   ;;  %s2799_s4 = inlined_call_operand.vmem [shape: f32[8,32], index: 4, kind: output, shape index: {}]  }
   0x1   :  { %s2307_s17 = smov 0  }
   0x2 LB: > { %s23_s18 = sadd.s32 1, %s2269_s16  ;;  %p1993_p0 = scmp.ge.s32.totalorder %s2273_s17, 1  ;;  %s2273_s17 = sphi %s2307_s17, %s14_s17   ;;  %s2269_s16 = sphi %s2305_s16, %s2801_s16   ;;  %s2265_s15 = sphi %s2303_s15, %s2800_s15  }
   0x3   : > { %p24_p1 = scmp.ge.s32.totalorder %s23_s18, 4  ;;  %p183_p2 = scmp.lt.s32.totalorder %s2273_s17, 5 }
   0x5   : > { %s2803_s18 = smov (%p24_p1, %s23_s18), 0  ;;  %p184_p3 = pnand %p1993_p0, %p183_p2 }
   0x6   : > { %s1994_s19 = sshll.u32 (!%p184_p3), %s2265_s15, 4  ;;  %p1996_p5 = scmp.ne.s32.totalorder (!%p184_p3), %s2265_s15, 0 }
   0x7   : > { %187 = sbr.rel (%p184_p3) target bundleno = 763 (0x2fb), region = 36  ;;  %p213_p4 = scmp.lt.s32.totalorder (!%p184_p3), %s1994_s19, 63 }
   0xc   : > { %s2805_s19 = smov (!%p213_p4, %s1994_s19), 63  ;;  %227 = sbr.rel (%p1996_p5) target bundleno = 19 (0x13), region = 40 }
   0xd   : > { %s1995_s20 = sshll.u32 %s2805_s19, 3 }
   0xe   : > { %s2324_s23 = scalar_lea.vmem %s2795_s0, %s1995_s20 }
  0x11   : > { %vm228_vm0 = vcmask 261120   ;;  %v2275_v0 = vmov 0.0  }
  0x12   : > { %229 = vst.msk [vmem:[%s2799_s4] sm:$0xff] %vm228_vm0, %v2275_v0 }
  0x13 PF: > { %v230_v1 = vld [vmem:[%s2324_s23] sm:$0xff]  ;;  %v231_v2 = vld [vmem:[%s2324_s23 + $0x8] sm:$0xff]  ;;  %v2276_v3 = vmov 0.0   ;;  %vm262_vm1 = vcmask 64512   ;;  %vm2277_vm2 = vmmov 0   ;;  %v232_v6 = vld [vmem:[%s2324_s23 + $0x10] sm:$0xff] }
  0x14   : > { %2084 = vmatprep.subr.mxu0 %v2276_v3  ;;  %2089 = vmatprep.subr.mxu1 %v2276_v3  ;;  %v246_v4 = vld [vmem:[%s2796_s1] sm:$0xff]  ;;  %v247_v5 = vld [vmem:[%s2796_s1 + $0x8] sm:$0xff]  ;;  %v233_v7 = vld [vmem:[%s2324_s23 + $0x18] sm:$0xff]  ;;  %vm1646_vm3 = vcmask 261120  }
  0x15   : > { %2085 = vmatpush3.msra.mxu0 %v230_v1  ;;  %2086 = vmatprep.mubr.msk.f32.mxu0 %vm2277_vm2, %v2276_v3  ;;  %v248_v8 = vld [vmem:[%s2796_s1 + $0x10] sm:$0xff]  ;;  %v249_v9 = vld [vmem:[%s2796_s1 + $0x18] sm:$0xff]  ;;  %v234_v10 = vld [vmem:[%s2324_s23 + $0x20] sm:$0xff] }
  0x16   : > { %2090 = vmatpush3.msra.mxu1 %v231_v2  ;;  %2091 = vmatprep.mubr.msk.f32.mxu1 %vm2277_vm2, %v2276_v3  ;;  %v235_v11 = vld [vmem:[%s2324_s23 + $0x28] sm:$0xff]  ;;  %v250_v12 = vld [vmem:[%s2796_s1 + $0x20] sm:$0xff]  ;;  %v236_v14 = vld [vmem:[%s2324_s23 + $0x30] sm:$0xff] }
  0x17   : > { %2087 = vmatmul.mubr.msk.f32.vlgmr.msra.gmra.mxu0 %vm262_vm1, %v246_v4  ;;  %2092 = vmatmul.mubr.msk.f32.vlgmr.msra.gmra.mxu1 %vm262_vm1, %v247_v5  ;;  %v251_v13 = vld [vmem:[%s2796_s1 + $0x28] sm:$0xff]  ;;  %v237_v15 = vld [vmem:[%s2324_s23 + $0x38] sm:$0xff]  ;;  %v252_v16 = vld [vmem:[%s2796_s1 + $0x30] sm:$0xff] }
  0x18   : > { %2094 = vmatprep.subr.mxu0 %v2276_v3  ;;  %2099 = vmatprep.subr.mxu1 %v2276_v3  ;;  %v253_v17 = vld [vmem:[%s2796_s1 + $0x38] sm:$0xff]  ;;  %v238_v18 = vld [vmem:[%s2324_s23 + $0x40] sm:$0xff]  ;;  %v239_v19 = vld [vmem:[%s2324_s23 + $0x48] sm:$0xff] }
  0x19   : > { %2095 = vmatpush3.msra.mxu0 %v232_v6  ;;  %2100 = vmatpush3.msra.mxu1 %v233_v7  ;;  %v254_v20 = vld [vmem:[%s2796_s1 + $0x40] sm:$0xff]  ;;  %v255_v21 = vld [vmem:[%s2796_s1 + $0x48] sm:$0xff]  ;;  %v240_v22 = vld [vmem:[%s2324_s23 + $0x50] sm:$0xff] }
  0x1a   : > { %2096 = vmatprep.mubr.msk.f32.mxu0 %vm2277_vm2, %v2276_v3  ;;  %2101 = vmatprep.mubr.msk.f32.mxu1 %vm2277_vm2, %v2276_v3  ;;  %v241_v23 = vld [vmem:[%s2324_s23 + $0x58] sm:$0xff]  ;;  %v256_v24 = vld [vmem:[%s2796_s1 + $0x50] sm:$0xff]  ;;  %v242_v26 = vld [vmem:[%s2324_s23 + $0x60] sm:$0xff] }
  0x1b   : > { %2097 = vmatmul.mubr.msk.f32.vlgmr.msra.gmra.mxu0 %vm262_vm1, %v248_v8  ;;  %2102 = vmatmul.mubr.msk.f32.vlgmr.msra.gmra.mxu1 %vm262_vm1, %v249_v9  ;;  %v257_v25 = vld [vmem:[%s2796_s1 + $0x58] sm:$0xff]  ;;  %v243_v27 = vld [vmem:[%s2324_s23 + $0x68] sm:$0xff]  ;;  %v258_v28 = vld [vmem:[%s2796_s1 + $0x60] sm:$0xff] }
  0x1c   : > { %2104 = vmatprep.subr.mxu0 %v2276_v3  ;;  %2106 = vmatprep.mubr.msk.f32.mxu0 %vm2277_vm2, %v2276_v3  ;;  %v259_v29 = vld [vmem:[%s2796_s1 + $0x68] sm:$0xff]  ;;  %v244_v30 = vld [vmem:[%s2324_s23 + $0x70] sm:$0xff]  ;;  %v245_v31 = vld [vmem:[%s2324_s23 + $0x78] sm:$0xff] }
  0x1d   : > { %2105 = vmatpush3.msra.mxu0 %v234_v10  ;;  %2109 = vmatprep.subr.mxu1 %v2276_v3  ;;  %v260_v32 = vld [vmem:[%s2796_s1 + $0x70] sm:$0xff]  ;;  %v261_v33 = vld [vmem:[%s2796_s1 + $0x78] sm:$0xff]  ;;  %v1431_v34 = vld [vmem:[%s2797_s2] sm:$0xff] }
  0x1e   : > { %2110 = vmatpush3.msra.mxu1 %v235_v11  ;;  %2111 = vmatprep.mubr.msk.f32.mxu1 %vm2277_vm2, %v2276_v3  ;;  %v2479_v4 = vld [vmem:[%s2798_s3] ss:$0 sm:$0xff] }
  0x1f   : > { %2107 = vmatmul.mubr.msk.f32.vlgmr.msra.gmra.mxu0 %vm262_vm1, %v250_v12  ;;  %2112 = vmatmul.mubr.msk.f32.vlgmr.msra.gmra.mxu1 %vm262_vm1, %v251_v13 }
  0x20   : > { %2114 = vmatprep.subr.mxu0 %v2276_v3  ;;  %2116 = vmatprep.mubr.msk.f32.mxu0 %vm2277_vm2, %v2276_v3 }
  0x21   : > { %2115 = vmatpush3.msra.mxu0 %v236_v14  ;;  %2119 = vmatprep.subr.mxu1 %v2276_v3 }
  0x22   : > { %2120 = vmatpush3.msra.mxu1 %v237_v15  ;;  %2121 = vmatprep.mubr.msk.f32.mxu1 %vm2277_vm2, %v2276_v3 }
  0x23   : > { %2117 = vmatmul.mubr.msk.f32.vlgmr.msra.gmra.mxu0 %vm262_vm1, %v252_v16  ;;  %2122 = vmatmul.mubr.msk.f32.vlgmr.msra.gmra.mxu1 %vm262_vm1, %v253_v17 }
  0x24   : > { %2124 = vmatprep.subr.mxu0 %v2276_v3  ;;  %2126 = vmatprep.mubr.msk.f32.mxu0 %vm2277_vm2, %v2276_v3 }
  0x25   : > { %2125 = vmatpush3.msra.mxu0 %v238_v18  ;;  %2129 = vmatprep.subr.mxu1 %v2276_v3 }
  0x26   : > { %2130 = vmatpush3.msra.mxu1 %v239_v19  ;;  %2131 = vmatprep.mubr.msk.f32.mxu1 %vm2277_vm2, %v2276_v3 }
  0x27   : > { %2127 = vmatmul.mubr.msk.f32.vlgmr.msra.gmra.mxu0 %vm262_vm1, %v254_v20  ;;  %2132 = vmatmul.mubr.msk.f32.vlgmr.msra.gmra.mxu1 %vm262_vm1, %v255_v21 }
  0x28   : > { %2134 = vmatprep.subr.mxu0 %v2276_v3  ;;  %2136 = vmatprep.mubr.msk.f32.mxu0 %vm2277_vm2, %v2276_v3 }
  0x29   : > { %2135 = vmatpush3.msra.mxu0 %v240_v22  ;;  %2139 = vmatprep.subr.mxu1 %v2276_v3 }
  0x2a   : > { %2140 = vmatpush3.msra.mxu1 %v241_v23  ;;  %2141 = vmatprep.mubr.msk.f32.mxu1 %vm2277_vm2, %v2276_v3 }
  0x2b   : > { %2137 = vmatmul.mubr.msk.f32.vlgmr.msra.gmra.mxu0 %vm262_vm1, %v256_v24  ;;  %2142 = vmatmul.mubr.msk.f32.vlgmr.msra.gmra.mxu1 %vm262_vm1, %v257_v25 }
  0x2c   : > { %2144 = vmatprep.subr.mxu0 %v2276_v3  ;;  %2146 = vmatprep.mubr.msk.f32.mxu0 %vm2277_vm2, %v2276_v3 }
  0x2d   : > { %2145 = vmatpush3.msra.mxu0 %v242_v26  ;;  %2149 = vmatprep.subr.mxu1 %v2276_v3 }
  0x2e   : > { %2150 = vmatpush3.msra.mxu1 %v243_v27  ;;  %2151 = vmatprep.mubr.msk.f32.mxu1 %vm2277_vm2, %v2276_v3 }
  0x2f   : > { %2147 = vmatmul.mubr.msk.f32.vlgmr.msra.gmra.mxu0 %vm262_vm1, %v258_v28  ;;  %2152 = vmatmul.mubr.msk.f32.vlgmr.msra.gmra.mxu1 %vm262_vm1, %v259_v29 }
  0x30   : > { %2154 = vmatprep.subr.mxu0 %v2276_v3  ;;  %2156 = vmatprep.mubr.msk.f32.mxu0 %vm2277_vm2, %v2276_v3 }
  0x31   : > { %2155 = vmatpush3.msra.mxu0 %v244_v30  ;;  %2159 = vmatprep.subr.mxu1 %v2276_v3 }
  0x32   : > { %2160 = vmatpush3.msra.mxu1 %v245_v31  ;;  %2161 = vmatprep.mubr.msk.f32.mxu1 %vm2277_vm2, %v2276_v3 }
  0x33   : > { %2157 = vmatmul.mubr.msk.f32.vlgmr.msra.gmra.mxu0 %vm262_vm1, %v260_v32  ;;  %2162 = vmatmul.mubr.msk.f32.vlgmr.msra.gmra.mxu1 %vm262_vm1, %v261_v33 }
  0x34   : > { %2164 = vmatprep.subr.mxu0 %v1431_v34  ;;  %2190 = vmatprep.subr.mxu1 %v1431_v34 }
  0x35   : > { %2165 = vmatpush3.msra.mxu0 %v1431_v34  ;;  %2191 = vmatpush3.msra.mxu1 %v1431_v34 }
  0xd7   : > { %v332_v35 = vpop.f32.mrf.mxu0  ;;  %v405_v36 = vpop.f32.mrf.mxu1 }
  0xd8   : > { %2166 = vmatprep.mubr.msk.f32.mxu0 %vm262_vm1, %v332_v35 }
  0xd9   : > { %v2088_v37 = vpop.f32.mrf.mxu0  ;;  %v2093_v38 = vpop.f32.mrf.mxu1  ;;  %2167 = vmatmul.mubr.msk.f32.vlgmr.msra.gmra.mxu0 %vm262_vm1, %v405_v36 }
  0xdb   : > { %v478_v39 = vpop.f32.mrf.mxu0  ;;  %v551_v40 = vpop.f32.mrf.mxu1 }
  0xdc   : > { %2169 = vmatprep.mubr.msk.f32.mxu0 %vm262_vm1, %v478_v39 }
  0xdd   : > { %v2098_v41 = vpop.f32.mrf.mxu0  ;;  %v2103_v42 = vpop.f32.mrf.mxu1  ;;  %2170 = vmatmul.mubr.msk.f32.gmra.mxu0 %vm262_vm1, %v551_v40 }
  0xdf   : > { %v624_v43 = vpop.f32.mrf.mxu0  ;;  %v697_v44 = vpop.f32.mrf.mxu1 }
  0xe0   : > { %2172 = vmatprep.mubr.msk.f32.mxu0 %vm262_vm1, %v624_v43 }
  0xe1   : > { %v2108_v45 = vpop.f32.mrf.mxu0  ;;  %2173 = vmatmul.mubr.msk.f32.gmra.mxu0 %vm262_vm1, %v697_v44  ;;  %v2113_v46 = vpop.f32.mrf.mxu1 }
  0xe3   : > { %v770_v47 = vpop.f32.mrf.mxu0  ;;  %v843_v48 = vpop.f32.mrf.mxu1 }
  0xe4   : > { %2175 = vmatprep.mubr.msk.f32.mxu0 %vm262_vm1, %v770_v47 }
  0xe5   : > { %v2118_v49 = vpop.f32.mrf.mxu0  ;;  %2176 = vmatmul.mubr.msk.f32.gmra.mxu0 %vm262_vm1, %v843_v48  ;;  %v2123_v50 = vpop.f32.mrf.mxu1 }
  0xe7   : > { %v916_v51 = vpop.f32.mrf.mxu0  ;;  %v989_v52 = vpop.f32.mrf.mxu1 }
  0xe8   : > { %2178 = vmatprep.mubr.msk.f32.mxu1 %vm262_vm1, %v916_v51 }
  0xe9   : > { %v2128_v53 = vpop.f32.mrf.mxu0  ;;  %2179 = vmatmul.mubr.msk.f32.vlgmr.msra.gmra.mxu1 %vm262_vm1, %v989_v52  ;;  %v2133_v54 = vpop.f32.mrf.mxu1 }
  0xeb   : > { %v1062_v55 = vpop.f32.mrf.mxu0  ;;  %v1135_v56 = vpop.f32.mrf.mxu1 }
  0xec   : > { %2181 = vmatprep.mubr.msk.f32.mxu1 %vm262_vm1, %v1062_v55 }
  0xed   : > { %v2138_v57 = vpop.f32.mrf.mxu0  ;;  %2182 = vmatmul.mubr.msk.f32.gmra.mxu1 %vm262_vm1, %v1135_v56  ;;  %v2143_v58 = vpop.f32.mrf.mxu1 }
  0xef   : > { %v1208_v59 = vpop.f32.mrf.mxu0  ;;  %v1281_v60 = vpop.f32.mrf.mxu1 }
  0xf0   : > { %2184 = vmatprep.mubr.msk.f32.mxu1 %vm262_vm1, %v1208_v59 }
  0xf1   : > { %v2148_v61 = vpop.f32.mrf.mxu0  ;;  %2185 = vmatmul.mubr.msk.f32.gmra.mxu1 %vm262_vm1, %v1281_v60  ;;  %v2153_v62 = vpop.f32.mrf.mxu1 }
  0xf3   : > { %v1354_v63 = vpop.f32.mrf.mxu0  ;;  %v1427_v0 = vpop.f32.mrf.mxu1 }
  0xf4   : > { %2187 = vmatprep.mubr.msk.f32.mxu1 %vm262_vm1, %v1354_v63 }
  0xf5   : > { %2188 = vmatmul.mubr.msk.f32.gmra.mxu1 %vm262_vm1, %v1427_v0  ;;  %v2158_v1 = vpop.f32.mrf.mxu0  ;;  %v2163_v2 = vpop.f32.mrf.mxu1 }
 0x199   : > { %v2168_v3 = vpop.f32.mrf.mxu0 }
 0x19a   : > { %v2482_v6 = vadd.f32 %v2168_v3, %v2479_v4 }
 0x19b   : > { %v1551_v5 = vpop.f32.mrf.mxu0 }
 0x19c   : > { %v2485_v7 = vadd.f32 %v2479_v4, %v1551_v5  ;;  %v1631_v11 = vmax.f32 %v2482_v6, 0.0 }
 0x19d   : > { %v2171_v8 = vpop.f32.mrf.mxu0 }
 0x19e   : > { %v1630_v9 = vmax.f32 %v2485_v7, 0.0  ;;  %v2490_v12 = vadd.f32 %v2171_v8, %v2479_v4  ;;  %v1650_v22 = vsel %vm1646_vm3, %v1631_v11, 0.0 }
 0x19f   : > { %v1561_v10 = vpop.f32.mrf.mxu0 }
 0x1a0   : > { %v2493_v13 = vadd.f32 %v2479_v4, %v1561_v10  ;;  %v1647_v14 = vsel %vm1646_vm3, %v1630_v9, 0.0  ;;  %v1633_v19 = vmax.f32 %v2490_v12, 0.0 }
 0x1a1   : > { %v2174_v15 = vpop.f32.mrf.mxu0  ;;  %1648 = vadd.xlane.f32.xlu0 %v1647_v14 }
 0x1a2   : > { %v1632_v16 = vmax.f32 %v2493_v13, 0.0  ;;  %v2500_v17 = vadd.f32 %v2174_v15, %v2479_v4  ;;  %v1656_v29 = vsel %vm1646_vm3, %v1633_v19, 0.0 }
 0x1a3   : > { %v1571_v18 = vpop.f32.mrf.mxu0 }
 0x1a4   : > { %v2504_v20 = vadd.f32 %v2479_v4, %v1571_v18  ;;  %v1653_v21 = vsel %vm1646_vm3, %v1632_v16, 0.0  ;;  %v1635_v25 = vmax.f32 %v2500_v17, 0.0 }
 0x1a5   : > { %v2177_v23 = vpop.f32.mrf.mxu0  ;;  %1654 = vadd.xlane.f32.xlu1 %v1653_v21  ;;  %1651 = vadd.xlane.f32.xlu0 %v1650_v22 }
 0x1a6   : > { %v1634_v24 = vmax.f32 %v2504_v20, 0.0  ;;  %v2515_v27 = vadd.f32 %v2177_v23, %v2479_v4  ;;  %v1662_v34 = vsel %vm1646_vm3, %v1635_v25, 0.0 }
 0x1a7   : > { %v1581_v26 = vpop.f32.mrf.mxu0 }
 0x1a8   : > { %v2518_v28 = vadd.f32 %v2479_v4, %v1581_v26  ;;  %v1659_v30 = vsel %vm1646_vm3, %v1634_v24, 0.0  ;;  %v1637_v35 = vmax.f32 %v2515_v27, 0.0 }
 0x1a9   : > { %v2180_v31 = vpop.f32.mrf.mxu1  ;;  %1657 = vadd.xlane.f32.xlu1 %v1656_v29  ;;  %1660 = vadd.xlane.f32.xlu0 %v1659_v30 }
 0x1aa   : > { %v1636_v32 = vmax.f32 %v2518_v28, 0.0  ;;  %v2532_v36 = vadd.f32 %v2180_v31, %v2479_v4  ;;  %v1668_v45 = vsel %vm1646_vm3, %v1637_v35, 0.0 }
 0x1ab   : > { %v1591_v33 = vpop.f32.mrf.mxu1 }
 0x1ac   : > { %v2535_v37 = vadd.f32 %v2479_v4, %v1591_v33  ;;  %v1665_v38 = vsel %vm1646_vm3, %v1636_v32, 0.0  ;;  %v1639_v43 = vmax.f32 %v2532_v36, 0.0 }
 0x1ad   : > { %v2183_v39 = vpop.f32.mrf.mxu1  ;;  %1663 = vadd.xlane.f32.xlu1 %v1662_v34  ;;  %1666 = vadd.xlane.f32.xlu0 %v1665_v38 }
 0x1ae   : > { %v1638_v40 = vmax.f32 %v2535_v37, 0.0  ;;  %v2542_v41 = vadd.f32 %v2183_v39, %v2479_v4  ;;  %v1674_v53 = vsel %vm1646_vm3, %v1639_v43, 0.0 }
 0x1af   : > { %v1601_v42 = vpop.f32.mrf.mxu1 }
 0x1b0   : > { %v2546_v44 = vadd.f32 %v2479_v4, %v1601_v42  ;;  %v1671_v46 = vsel %vm1646_vm3, %v1638_v40, 0.0  ;;  %v1641_v49 = vmax.f32 %v2542_v41, 0.0 }
 0x1b1   : > { %v2186_v47 = vpop.f32.mrf.mxu1  ;;  %1669 = vadd.xlane.f32.xlu1 %v1668_v45  ;;  %1672 = vadd.xlane.f32.xlu0 %v1671_v46 }
 0x1b2   : > { %v1640_v48 = vmax.f32 %v2546_v44, 0.0  ;;  %v2557_v51 = vadd.f32 %v2186_v47, %v2479_v4  ;;  %v1680_v58 = vsel %vm1646_vm3, %v1641_v49, 0.0 }
 0x1b3   : > { %v1611_v50 = vpop.f32.mrf.mxu1 }
 0x1b4   : > { %v2560_v52 = vadd.f32 %v2479_v4, %v1611_v50  ;;  %v1677_v54 = vsel %vm1646_vm3, %v1640_v48, 0.0  ;;  %v1643_v59 = vmax.f32 %v2557_v51, 0.0 }
 0x1b5   : > { %v2189_v55 = vpop.f32.mrf.mxu1  ;;  %1675 = vadd.xlane.f32.xlu1 %v1674_v53  ;;  %1678 = vadd.xlane.f32.xlu0 %v1677_v54 }
 0x1b6   : > { %v1642_v56 = vmax.f32 %v2560_v52, 0.0  ;;  %v2574_v60 = vadd.f32 %v2189_v55, %v2479_v4  ;;  %v1686_v1 = vsel %vm1646_vm3, %v1643_v59, 0.0 }
 0x1b7   : > { %v1621_v57 = vpop.f32.mrf.mxu1 }
 0x1b8   : > { %v2577_v61 = vadd.f32 %v2479_v4, %v1621_v57  ;;  %v1683_v62 = vsel %vm1646_vm3, %v1642_v56, 0.0  ;;  %v1645_v0 = vmax.f32 %v2574_v60, 0.0 }
 0x1b9   : > { %1681 = vadd.xlane.f32.xlu1 %v1680_v58  ;;  %1684 = vadd.xlane.f32.xlu0 %v1683_v62 }
 0x1ba   : > { %v1644_v63 = vmax.f32 %v2577_v61, 0.0  ;;  %v1692_v3 = vsel %vm1646_vm3, %v1645_v0, 0.0 }
 0x1bc   : > { %v1689_v2 = vsel %vm1646_vm3, %v1644_v63, 0.0 }
 0x1bd   : > { %1687 = vadd.xlane.f32.xlu1 %v1686_v1  ;;  %1690 = vadd.xlane.f32.xlu0 %v1689_v2 }
 0x1c1   : > { %1693 = vadd.xlane.f32.xlu1 %v1692_v3 }
 0x22a   : > { %v1649_v4 = vpop.xlane.xlu0 %1648 }
 0x22b   : > { %v1695_v5 = vmul.f32 0.03125, %v1649_v4 }
 0x22d   : > { %v2595_v8 = vsub.f32 %v1630_v9, %v1695_v5 }
 0x22e   : > { %v1655_v10 = vpop.xlane.xlu1 %1654  ;;  %v1652_v14 = vpop.xlane.xlu0 %1651 }
 0x22f   : > { %v1697_v15 = vmul.f32 0.03125, %v1655_v10  ;;  %v1696_v18 = vmul.f32 0.03125, %v1652_v14  ;;  %v1727_v21 = vmul.f32 %v2595_v8, %v2595_v8 }
 0x231   : > { %v2601_v22 = vsub.f32 %v1632_v16, %v1697_v15  ;;  %v2605_v23 = vsub.f32 %v1631_v11, %v1696_v18  ;;  %v1743_v26 = vsel %vm1646_vm3, %v1727_v21, 0.0 }
 0x232   : > { %v1658_v7 = vpop.xlane.xlu1 %1657  ;;  %1744 = vadd.xlane.f32.xlu0 %v1743_v26  ;;  %v1661_v9 = vpop.xlane.xlu0 %1660 }
 0x233   : > { %v1698_v29 = vmul.f32 0.03125, %v1658_v7  ;;  %v1699_v30 = vmul.f32 0.03125, %v1661_v9  ;;  %v1729_v31 = vmul.f32 %v2601_v22, %v2601_v22  ;;  %v1728_v33 = vmul.f32 %v2605_v23, %v2605_v23 }
 0x235   : > { %v2614_v13 = vsub.f32 %v1633_v19, %v1698_v29  ;;  %v2618_v6 = vsub.f32 %v1634_v24, %v1699_v30  ;;  %v1749_v11 = vsel %vm1646_vm3, %v1729_v31, 0.0  ;;  %v1746_v16 = vsel %vm1646_vm3, %v1728_v33, 0.0 }
 0x236   : > { %v1664_v34 = vpop.xlane.xlu1 %1663  ;;  %1750 = vadd.xlane.f32.xlu0 %v1749_v11  ;;  %1747 = vadd.xlane.f32.xlu1 %v1746_v16  ;;  %v1667_v38 = vpop.xlane.xlu0 %1666 }
 0x237   : > { %v1700_v39 = vmul.f32 0.03125, %v1664_v34  ;;  %v1701_v42 = vmul.f32 0.03125, %v1667_v38  ;;  %v1730_v45 = vmul.f32 %v2614_v13, %v2614_v13  ;;  %v1731_v12 = vmul.f32 %v2618_v6, %v2618_v6 }
 0x239   : > { %v2628_v19 = vsub.f32 %v1635_v25, %v1700_v39  ;;  %v2632_v20 = vsub.f32 %v1636_v32, %v1701_v42  ;;  %v1752_v24 = vsel %vm1646_vm3, %v1730_v45, 0.0  ;;  %v1755_v46 = vsel %vm1646_vm3, %v1731_v12, 0.0 }
 0x23a   : > { %v1670_v47 = vpop.xlane.xlu1 %1669  ;;  %1753 = vadd.xlane.f32.xlu1 %v1752_v24  ;;  %1756 = vadd.xlane.f32.xlu0 %v1755_v46  ;;  %v1673_v50 = vpop.xlane.xlu0 %1672 }
 0x23b   : > { %v1702_v53 = vmul.f32 0.03125, %v1670_v47  ;;  %v1703_v54 = vmul.f32 0.03125, %v1673_v50  ;;  %v1732_v55 = vmul.f32 %v2628_v19, %v2628_v19  ;;  %v1733_v17 = vmul.f32 %v2632_v20, %v2632_v20 }
 0x23d   : > { %v2642_v25 = vsub.f32 %v1637_v35, %v1702_v53  ;;  %v2646_v28 = vsub.f32 %v1638_v40, %v1703_v54  ;;  %v1758_v32 = vsel %vm1646_vm3, %v1732_v55, 0.0  ;;  %v1761_v57 = vsel %vm1646_vm3, %v1733_v17, 0.0 }
 0x23e   : > { %v1676_v58 = vpop.xlane.xlu1 %1675  ;;  %1759 = vadd.xlane.f32.xlu1 %v1758_v32  ;;  %1762 = vadd.xlane.f32.xlu0 %v1761_v57  ;;  %v1679_v62 = vpop.xlane.xlu0 %1678 }
 0x23f   : > { %v1704_v1 = vmul.f32 0.03125, %v1676_v58  ;;  %v1705_v2 = vmul.f32 0.03125, %v1679_v62  ;;  %v1734_v3 = vmul.f32 %v2642_v25, %v2642_v25  ;;  %v1735_v27 = vmul.f32 %v2646_v28, %v2646_v28 }
 0x241   : > { %v2656_v35 = vsub.f32 %v1639_v43, %v1704_v1  ;;  %v2660_v37 = vsub.f32 %v1640_v48, %v1705_v2  ;;  %v1764_v40 = vsel %vm1646_vm3, %v1734_v3, 0.0  ;;  %v1767_v4 = vsel %vm1646_vm3, %v1735_v27, 0.0 }
 0x242   : > { %v1682_v5 = vpop.xlane.xlu1 %1681  ;;  %1765 = vadd.xlane.f32.xlu1 %v1764_v40  ;;  %1768 = vadd.xlane.f32.xlu0 %v1767_v4  ;;  %v1685_v10 = vpop.xlane.xlu0 %1684 }
 0x243   : > { %v1706_v14 = vmul.f32 0.03125, %v1682_v5  ;;  %v1707_v15 = vmul.f32 0.03125, %v1685_v10  ;;  %v1736_v18 = vmul.f32 %v2656_v35, %v2656_v35  ;;  %v1737_v36 = vmul.f32 %v2660_v37, %v2660_v37 }
 0x245   : > { %v2670_v43 = vsub.f32 %v1641_v49, %v1706_v14  ;;  %v2674_v44 = vsub.f32 %v1642_v56, %v1707_v15  ;;  %v1770_v48 = vsel %vm1646_vm3, %v1736_v18, 0.0  ;;  %v1773_v21 = vsel %vm1646_vm3, %v1737_v36, 0.0  ;;  %v2708_v14 = vld [vmem:[%s2798_s3 + $0x1] ss:$0 sm:$0xff] }
 0x246   : > { %v1688_v26 = vpop.xlane.xlu1 %1687  ;;  %1771 = vadd.xlane.f32.xlu1 %v1770_v48  ;;  %1774 = vadd.xlane.f32.xlu0 %v1773_v21  ;;  %v1691_v7 = vpop.xlane.xlu0 %1690 }
 0x247   : > { %v1708_v9 = vmul.f32 0.03125, %v1688_v26  ;;  %v1709_v29 = vmul.f32 0.03125, %v1691_v7  ;;  %v1738_v30 = vmul.f32 %v2670_v43, %v2670_v43  ;;  %v1739_v41 = vmul.f32 %v2674_v44, %v2674_v44  ;;  %v2714_v26 = vld [vmem:[%s2798_s3 + $0x2] ss:$0 sm:$0xff] }
 0x249   : > { %v2684_v49 = vsub.f32 %v1643_v59, %v1708_v9  ;;  %v2688_v52 = vsub.f32 %v1644_v63, %v1709_v29  ;;  %v1776_v56 = vsel %vm1646_vm3, %v1738_v30, 0.0  ;;  %v1779_v31 = vsel %vm1646_vm3, %v1739_v41, 0.0 }
 0x24a   : > { %v1694_v33 = vpop.xlane.xlu1 %1693  ;;  %1777 = vadd.xlane.f32.xlu1 %v1776_v56  ;;  %1780 = vadd.xlane.f32.xlu0 %v1779_v31 }
 0x24b   : > { %v1710_v11 = vmul.f32 0.03125, %v1694_v33  ;;  %v1740_v16 = vmul.f32 %v2684_v49, %v2684_v49  ;;  %v1741_v51 = vmul.f32 %v2688_v52, %v2688_v52 }
 0x24d   : > { %v2698_v59 = vsub.f32 %v1645_v0, %v1710_v11  ;;  %v1782_v61 = vsel %vm1646_vm3, %v1740_v16, 0.0  ;;  %v1785_v63 = vsel %vm1646_vm3, %v1741_v51, 0.0 }
 0x24e   : > { %1783 = vadd.xlane.f32.xlu1 %v1782_v61  ;;  %1786 = vadd.xlane.f32.xlu0 %v1785_v63 }
 0x24f   : > { %v1742_v34 = vmul.f32 %v2698_v59, %v2698_v59 }
 0x251   : > { %v1788_v38 = vsel %vm1646_vm3, %v1742_v34, 0.0 }
 0x252   : > { %1789 = vadd.xlane.f32.xlu1 %v1788_v38 }
 0x2bb   : > { %v1745_v39 = vpop.xlane.xlu0 %1744 }
 0x2bc   : > { %v1791_v42 = vmul.f32 0.03125, %v1745_v39 }
 0x2be   : > { %v1807_v45 = vadd.f32 1e-05, %v1791_v42 }
 0x2bf   : > { %v1748_v12 = vpop.xlane.xlu1 %1747  ;;  %v1751_v24 = vpop.xlane.xlu0 %1750 }
 0x2c0   : > { %2219 = vrsqrt.f32 %v1807_v45  ;;  %v1792_v60 = vmul.f32 0.03125, %v1748_v12  ;;  %v1793_v0 = vmul.f32 0.03125, %v1751_v24 }
 0x2c2   : > { %v1808_v46 = vadd.f32 1e-05, %v1792_v60  ;;  %v1809_v47 = vadd.f32 1e-05, %v1793_v0 }
 0x2c3   : > { %v1754_v50 = vpop.xlane.xlu1 %1753  ;;  %v1757_v53 = vpop.xlane.xlu0 %1756 }
 0x2c4   : > { %2221 = vrsqrt.f32 %v1808_v46  ;;  %v1794_v54 = vmul.f32 0.03125, %v1754_v50  ;;  %v1795_v55 = vmul.f32 0.03125, %v1757_v53 }
 0x2c5   : > { %2223 = vrsqrt.f32 %v1809_v47 }
 0x2c6   : > { %v1810_v17 = vadd.f32 1e-05, %v1794_v54  ;;  %v1811_v32 = vadd.f32 1e-05, %v1795_v55 }
 0x2c7   : > { %v1760_v57 = vpop.xlane.xlu1 %1759  ;;  %v1763_v58 = vpop.xlane.xlu0 %1762 }
 0x2c8   : > { %2225 = vrsqrt.f32 %v1810_v17  ;;  %v1796_v62 = vmul.f32 0.03125, %v1760_v57  ;;  %v1797_v1 = vmul.f32 0.03125, %v1763_v58 }
 0x2c9   : > { %2227 = vrsqrt.f32 %v1811_v32 }
 0x2ca   : > { %v1812_v2 = vadd.f32 1e-05, %v1796_v62  ;;  %v1813_v3 = vadd.f32 1e-05, %v1797_v1 }
 0x2cb   : > { %v1766_v27 = vpop.xlane.xlu1 %1765  ;;  %v1769_v40 = vpop.xlane.xlu0 %1768 }
 0x2cc   : > { %2229 = vrsqrt.f32 %v1812_v2  ;;  %v1798_v4 = vmul.f32 0.03125, %v1766_v27  ;;  %v1799_v5 = vmul.f32 0.03125, %v1769_v40 }
 0x2cd   : > { %v2220_v10 = vpop.eup %2219  ;;  %2231 = vrsqrt.f32 %v1813_v3 }
 0x2ce   : > { %v1839_v15 = vmul.f32 %v2220_v10, %v2595_v8  ;;  %v1814_v18 = vadd.f32 1e-05, %v1798_v4  ;;  %v1815_v36 = vadd.f32 1e-05, %v1799_v5 }
 0x2cf   : > { %v1772_v48 = vpop.xlane.xlu1 %1771  ;;  %v1775_v21 = vpop.xlane.xlu0 %1774 }
 0x2d0   : > { %v1860_v7 = vmul.f32 %v2708_v14, %v1839_v15  ;;  %2233 = vrsqrt.f32 %v1814_v18  ;;  %v1800_v9 = vmul.f32 0.03125, %v1772_v48  ;;  %v1801_v29 = vmul.f32 0.03125, %v1775_v21 }
 0x2d1   : > { %v2222_v30 = vpop.eup %2221  ;;  %2235 = vrsqrt.f32 %v1815_v36 }
 0x2d2   : > { %v2224_v41 = vpop.eup %2223  ;;  %v1840_v56 = vmul.f32 %v2222_v30, %v2605_v23  ;;  %v1816_v8 = vadd.f32 1e-05, %v1800_v9  ;;  %v1817_v31 = vadd.f32 1e-05, %v1801_v29  ;;  %v1881_v33 = vadd.f32 %v2714_v26, %v1860_v7 }
 0x2d3   : > { %v1841_v11 = vmul.f32 %v2224_v41, %v2601_v22  ;;  %v1778_v16 = vpop.xlane.xlu1 %1777  ;;  %v1781_v51 = vpop.xlane.xlu0 %1780 }
 0x2d4   : > { %v1861_v61 = vmul.f32 %v2708_v14, %v1840_v56  ;;  %2237 = vrsqrt.f32 %v1816_v8  ;;  %v1802_v63 = vmul.f32 0.03125, %v1778_v16  ;;  %v1803_v39 = vmul.f32 0.03125, %v1781_v51 }
 0x2d5   : > { %v2226_v34 = vpop.eup %2225  ;;  %v1862_v38 = vmul.f32 %v2708_v14, %v1841_v11  ;;  %2239 = vrsqrt.f32 %v1817_v31  ;;  %v1898_v24 = vsel %vm1646_vm3, %v1881_v33, 0.0 }
 0x2d6   : > { %v2228_v42 = vpop.eup %2227  ;;  %v1882_v23 = vadd.f32 %v2714_v26, %v1861_v61  ;;  %v1842_v45 = vmul.f32 %v2226_v34, %v2614_v13  ;;  %v1818_v12 = vadd.f32 1e-05, %v1802_v63  ;;  %v1819_v0 = vadd.f32 1e-05, %v1803_v39 }
 0x2d7   : > { %v1883_v22 = vadd.f32 %v2714_v26, %v1862_v38  ;;  %v1843_v60 = vmul.f32 %v2228_v42, %v2618_v6  ;;  %v1784_v46 = vpop.xlane.xlu1 %1783  ;;  %v1787_v47 = vpop.xlane.xlu0 %1786 }
 0x2d8   : > { %v1899_v50 = vsel %vm1646_vm3, %v1882_v23, 0.0  ;;  %v1863_v53 = vmul.f32 %v2708_v14, %v1842_v45  ;;  %2241 = vrsqrt.f32 %v1818_v12  ;;  %v1804_v54 = vmul.f32 0.03125, %v1784_v46 }
 0x2d9   : > { %v2230_v55 = vpop.eup %2229  ;;  %v1900_v17 = vadd.f32 %v1899_v50, %v1898_v24  ;;  %v1901_v13 = vsel %vm1646_vm3, %v1883_v22, 0.0  ;;  %v1864_v32 = vmul.f32 %v2708_v14, %v1843_v60  ;;  %2243 = vrsqrt.f32 %v1819_v0 }
 0x2da   : > { %v2232_v57 = vpop.eup %2231  ;;  %v1884_v58 = vadd.f32 %v2714_v26, %v1863_v53  ;;  %v1844_v6 = vmul.f32 %v2230_v55, %v2628_v19  ;;  %v1820_v62 = vadd.f32 1e-05, %v1804_v54  ;;  %v1805_v1 = vmul.f32 0.03125, %v1787_v47 }
 0x2db   : > { %v1902_v2 = vadd.f32 %v1901_v13, %v1900_v17  ;;  %v1885_v3 = vadd.f32 %v2714_v26, %v1864_v32  ;;  %v1845_v27 = vmul.f32 %v2232_v57, %v2632_v20  ;;  %v1790_v40 = vpop.xlane.xlu1 %1789 }
 0x2dc   : > { %v1903_v4 = vsel %vm1646_vm3, %v1884_v58, 0.0  ;;  %v1865_v5 = vmul.f32 %v2708_v14, %v1844_v6  ;;  %2245 = vrsqrt.f32 %v1820_v62  ;;  %v1821_v10 = vadd.f32 1e-05, %v1805_v1 }
 0x2dd   : > { %v2234_v15 = vpop.eup %2233  ;;  %v1904_v18 = vadd.f32 %v1903_v4, %v1902_v2  ;;  %v1866_v36 = vmul.f32 %v2708_v14, %v1845_v27  ;;  %v1806_v48 = vmul.f32 0.03125, %v1790_v40  ;;  %v1905_v21 = vsel %vm1646_vm3, %v1885_v3, 0.0 }
 0x2de   : > { %v2236_v19 = vpop.eup %2235  ;;  %v1886_v7 = vadd.f32 %v2714_v26, %v1865_v5  ;;  %v1846_v9 = vmul.f32 %v2234_v15, %v2642_v25  ;;  %2247 = vrsqrt.f32 %v1821_v10 }
 0x2df   : > { %v1906_v20 = vadd.f32 %v1905_v21, %v1904_v18  ;;  %v1887_v29 = vadd.f32 %v2714_v26, %v1866_v36  ;;  %v1847_v30 = vmul.f32 %v2236_v19, %v2646_v28  ;;  %v1822_v41 = vadd.f32 1e-05, %v1806_v48  ;;  %v1897_v48 = vld [vmem:[%s2799_s4] sm:$0xff] }
 0x2e0   : > { %v1907_v56 = vsel %vm1646_vm3, %v1886_v7, 0.0  ;;  %v1867_v8 = vmul.f32 %v2708_v14, %v1846_v9 }
 0x2e1   : > { %v2238_v31 = vpop.eup %2237  ;;  %v1908_v33 = vadd.f32 %v1907_v56, %v1906_v20  ;;  %v1868_v11 = vmul.f32 %v2708_v14, %v1847_v30  ;;  %2249 = vrsqrt.f32 %v1822_v41  ;;  %v1909_v51 = vsel %vm1646_vm3, %v1887_v29, 0.0 }
 0x2e2   : > { %v2240_v16 = vpop.eup %2239  ;;  %v1888_v25 = vadd.f32 %v2714_v26, %v1867_v8  ;;  %v1848_v61 = vmul.f32 %v2238_v31, %v2656_v35 }
 0x2e3   : > { %v1910_v63 = vadd.f32 %v1909_v51, %v1908_v33  ;;  %v1889_v28 = vadd.f32 %v2714_v26, %v1868_v11  ;;  %v1849_v34 = vmul.f32 %v2240_v16, %v2660_v37 }
 0x2e4   : > { %v1911_v38 = vsel %vm1646_vm3, %v1888_v25, 0.0  ;;  %v1869_v39 = vmul.f32 %v2708_v14, %v1848_v61 }
 0x2e5   : > { %v2242_v42 = vpop.eup %2241  ;;  %v1912_v23 = vadd.f32 %v1911_v38, %v1910_v63  ;;  %v1870_v45 = vmul.f32 %v2708_v14, %v1849_v34  ;;  %v1913_v24 = vsel %vm1646_vm3, %v1889_v28, 0.0 }
 0x2e6   : > { %v2244_v12 = vpop.eup %2243  ;;  %v1890_v22 = vadd.f32 %v2714_v26, %v1869_v39  ;;  %v1850_v35 = vmul.f32 %v2242_v42, %v2670_v43 }
 0x2e7   : > { %v1914_v60 = vadd.f32 %v1913_v24, %v1912_v23  ;;  %v1891_v0 = vadd.f32 %v2714_v26, %v1870_v45  ;;  %v1851_v37 = vmul.f32 %v2244_v12, %v2674_v44 }
 0x2e8   : > { %v1915_v46 = vsel %vm1646_vm3, %v1890_v22, 0.0  ;;  %v1871_v47 = vmul.f32 %v2708_v14, %v1850_v35 }
 0x2e9   : > { %v2246_v50 = vpop.eup %2245  ;;  %v1916_v53 = vadd.f32 %v1915_v46, %v1914_v60  ;;  %v1872_v54 = vmul.f32 %v2708_v14, %v1851_v37  ;;  %v1917_v55 = vsel %vm1646_vm3, %v1891_v0, 0.0 }
 0x2ea   : > { %v1892_v17 = vadd.f32 %v2714_v26, %v1871_v47  ;;  %v1852_v13 = vmul.f32 %v2246_v50, %v2684_v49 }
 0x2eb   : > { %v2248_v43 = vpop.eup %2247  ;;  %v1918_v32 = vadd.f32 %v1917_v55, %v1916_v53  ;;  %v1893_v57 = vadd.f32 %v2714_v26, %v1872_v54 }
 0x2ec   : > { %v1919_v44 = vsel %vm1646_vm3, %v1892_v17, 0.0  ;;  %v1873_v58 = vmul.f32 %v2708_v14, %v1852_v13  ;;  %v1853_v6 = vmul.f32 %v2248_v43, %v2688_v52 }
 0x2ed   : > { %v1920_v62 = vadd.f32 %v1919_v44, %v1918_v32  ;;  %v1921_v2 = vsel %vm1646_vm3, %v1893_v57, 0.0 }
 0x2ee   : > { %v2250_v1 = vpop.eup %2249  ;;  %v1894_v3 = vadd.f32 %v2714_v26, %v1873_v58  ;;  %v1874_v27 = vmul.f32 %v2708_v14, %v1853_v6 }
 0x2ef   : > { %v1922_v40 = vadd.f32 %v1921_v2, %v1920_v62  ;;  %v1854_v49 = vmul.f32 %v2250_v1, %v2698_v59 }
 0x2f0   : > { %v1923_v4 = vsel %vm1646_vm3, %v1894_v3, 0.0  ;;  %v1895_v5 = vadd.f32 %v2714_v26, %v1874_v27 }
 0x2f1   : > { %v1924_v10 = vadd.f32 %v1923_v4, %v1922_v40  ;;  %v1875_v15 = vmul.f32 %v2708_v14, %v1854_v49 }
 0x2f2   : > { %v1925_v52 = vsel %vm1646_vm3, %v1895_v5, 0.0 }
 0x2f3   : > { %v1926_v18 = vadd.f32 %v1925_v52, %v1924_v10  ;;  %v1896_v36 = vadd.f32 %v2714_v26, %v1875_v15 }
 0x2f5   : > { %v1927_v19 = vsel %vm1646_vm3, %v1896_v36, 0.0 }
 0x2f6   : > { %v1928_v21 = vadd.f32 %v1927_v19, %v1926_v18 }
 0x2f8   : > { %v1929_v59 = vadd.f32 %v1928_v21, %v1897_v48 }
 0x2fa   : > { %1930 = vst.msk [vmem:[%s2799_s4] sm:$0xff] %vm1646_vm3, %v1929_v59 }
 0x2fb PF: > { %s14_s17 = sadd.s32 1, %s2273_s17   ;;  %s2800_s15 = smov %s2269_s16 }
 0x2fc   : > { %p11_p6 = scmp.ge.s32.totalorder %s14_s17, 6   ;;  %s2801_s16 = smov %s2803_s18 }
 0x2fe   :  { %13 = sbr.rel (!%p11_p6) target bundleno = 2 (0x2), region = 70 }

</bundles_post_ra>
